<compile_context>
chip_gen: v7x
topology: tpu7x:2x2x1
jax: 0.10.0
libtpu: 0.0.40
codegen_flags: <defaults>
</compile_context>

<pallas_src>
import jax
import jax.numpy as jnp
from jax.experimental import pallas as pl
from jax.experimental.pallas import tpu as pltpu


def _group_scales(num_layers: int = 3):
    """Per-channel-group scale factors implied by the module structure."""
    features = [[1.0]]                                   # per-feature lists of group scales
    for _ in range(num_layers):
        new = [1.5 * s for f in features for s in f]     # 1.5 * cat(features, 1)
        features.append(new)
    return [s for f in features for s in f]              # final cat(features, 1)


def densenet_scale_kernel(scales_ref, x_ref, o_ref):
    # grid = (B, K); axis 1 indexes the K replicated channel groups.
    k = pl.program_id(1)
    # x_ref: (C, H*W) block (resident in VMEM across consecutive k steps);
    # scales_ref: (K,) f32 in SMEM, scalar-indexed by k and broadcast on the VPU.
    o_ref[...] = x_ref[...] * scales_ref[k]


def densenet_blocks_forward(x, num_layers: int = 3):
    """x: [B, C, H, W] -> [B, (2**num_layers)*C, H, W], matching DenseNetBlocks."""
    B, C, H, W = x.shape
    scales = _group_scales(num_layers)
    K = len(scales)                                      # 2 ** num_layers
    HW = H * W

    # Lane-dense view: H*W maps onto the 128-wide lane axis.
    x2 = x.reshape(B, C, HW)
    scales_arr = jnp.asarray(scales, dtype=x.dtype)      # (K,) scale table -> SMEM

    out4 = pl.pallas_call(
        densenet_scale_kernel,
        out_shape=jax.ShapeDtypeStruct((B, K, C, HW), x.dtype),
        grid=(B, K),
        in_specs=[
            # Tiny scale table lives in SMEM (scalar-indexed per grid step).
            pl.BlockSpec(memory_space=pltpu.MemorySpace.SMEM),
            # One batch row per block; same block across k -> no re-DMA.
            pl.BlockSpec((None, C, HW), lambda b, k: (b, 0, 0)),
        ],
        # Output block = one (batch, channel-group) slab; last two dims are
        # full-extent / lane-dense, so stores are unmasked full-width vst.
        out_specs=pl.BlockSpec((None, None, C, HW), lambda b, k: (b, k, 0, 0)),
        compiler_params=pltpu.CompilerParams(
            dimension_semantics=("parallel", "parallel")),
    )(scales_arr, x2)

    return out4.reshape(B, K * C, H, W)


if __name__ == "__main__":
    key = jax.random.PRNGKey(0)
    B, C, H, W = 2, 4, 16, 16
    x = jax.random.normal(key, (B, C, H, W), dtype=jnp.float32)

    out = densenet_blocks_forward(x)
    out = jax.block_until_ready(out)

    # Pure-JAX reference mirroring the PyTorch module exactly.
    features = [x]
    for _ in range(3):
        features.append(1.5 * jnp.concatenate(features, axis=1))
    ref = jnp.concatenate(features, axis=1)

    assert out.shape == (B, 8 * C, H, W) and out.dtype == jnp.float32
    assert jnp.allclose(out, ref, atol=1e-5, rtol=1e-5)

    print("KERNEL_OK")
</pallas_src>

<mosaic_0001>
module attributes {stable_mosaic.version = 11 : i64} {
  func.func @densenet_scale_kernel(%arg0: i32, %arg1: i32, %arg2: memref<8xf32, #tpu.memory_space<smem>>, %arg3: memref<1x4x256xf32, #tpu.memory_space<vmem>>, %arg4: memref<1x1x4x256xf32, #tpu.memory_space<vmem>>) attributes {dimension_semantics = [#tpu.dimension_semantics<parallel>, #tpu.dimension_semantics<parallel>], iteration_bounds = array<i64: 2, 8>, scalar_prefetch = 0 : i64, scratch_operands = 0 : i64, tpu.core_type = #tpu.core_type<tc>, window_params = [{transform_indices = @transform_0, window_bounds = array<i64: 8>}, {transform_indices = @transform_1, window_bounds = array<i64: 1, 4, 256>}, {transform_indices = @transform_2, window_bounds = array<i64: 1, 1, 4, 256>}]} {
    %c0 = arith.constant 0 : index
    %c0_0 = arith.constant 0 : index
    %c0_1 = arith.constant 0 : index
    %0 = vector.load %arg3[%c0, %c0_0, %c0_1] : memref<1x4x256xf32, #tpu.memory_space<vmem>>, vector<1x4x256xf32>
    %1 = vector.shape_cast %0 : vector<1x4x256xf32> to vector<4x256xf32>
    %2 = arith.index_cast %arg1 : i32 to index
    %3 = memref.load %arg2[%2] : memref<8xf32, #tpu.memory_space<smem>>
    %4 = vector.broadcast %3 : f32 to vector<4x256xf32>
    %5 = arith.mulf %1, %4 : vector<4x256xf32>
    %c0_2 = arith.constant 0 : index
    %c0_3 = arith.constant 0 : index
    %c0_4 = arith.constant 0 : index
    %c0_5 = arith.constant 0 : index
    %6 = vector.load %arg4[%c0_2, %c0_3, %c0_4, %c0_5] : memref<1x1x4x256xf32, #tpu.memory_space<vmem>>, vector<1x1x4x256xf32>
    %7 = vector.shape_cast %6 : vector<1x1x4x256xf32> to vector<4x256xf32>
    %8 = vector.shape_cast %5 : vector<4x256xf32> to vector<1x1x4x256xf32>
    tpu.vector_store %arg4[%c0_2, %c0_3, %c0_4, %c0_5], %8 {strides = array<i32>} : memref<1x1x4x256xf32, #tpu.memory_space<vmem>>, vector<1x1x4x256xf32>,
    return
  }
  func.func @transform_0(%arg0: i32, %arg1: i32) -> i32 {
    %c0_i32 = arith.constant 0 : i32
    %c0_i32_0 = arith.constant 0 : i32
    return %c0_i32 : i32
  }
  func.func @transform_1(%arg0: i32, %arg1: i32) -> (i32, i32, i32) {
    %c0_i32 = arith.constant 0 : i32
    %c0_i32_0 = arith.constant 0 : i32
    %c0_i32_1 = arith.constant 0 : i32
    return %arg0, %c0_i32, %c0_i32_0 : i32, i32, i32
  }
  func.func @transform_2(%arg0: i32, %arg1: i32) -> (i32, i32, i32, i32) {
    %c0_i32 = arith.constant 0 : i32
    %c0_i32_0 = arith.constant 0 : i32
    %c0_i32_1 = arith.constant 0 : i32
    return %arg0, %arg1, %c0_i32, %c0_i32_0 : i32, i32, i32, i32
  }
}

</mosaic_0001>

<bundles_post_ra>
// kernel: tpu_custom_call.1
= control target key start
LH: loop header
LB: loop body
LE: loop exit
PB: predicated region body
PF: predicated region fallthrough
CT: control target
= control target key end

     0   :  { %s876_s0 = inlined_call_operand.hbm [shape: f32[8], index: 0, kind: input, shape index: {}]   ;;  %s877_s1 = inlined_call_operand.hbm [shape: f32[2,4,256], index: 1, kind: input, shape index: {}]   ;;  %s878_s2 = inlined_call_operand.hbm [shape: f32[2,8,4,256], index: 2, kind: output, shape index: {}]  }
   0x1   :  { %887 = sst [smem:[#allocation15_spill]] %s876_s0 }
   0x2   :  { %7 = vsyncpa [#allocation5], 0 }
   0x3   :  { %8 = vsyncpa [#allocation3], 0 }
   0x4   :  { %10 = vsyncpa [#allocation3 + $0x1], 0 }
   0x5   :  { %11 = vsyncpa [#allocation4], 0 }
   0x6   :  { %13 = vsyncpa [#allocation4 + $0x1], 0  ;;  %s625_s9 = smov 0   ;;  %s627_s10 = smov 0  }
   0x7   :  { %s629_s11 = smov 0   ;;  %s631_s12 = smov 0  }
   0x8   :  { %s633_s13 = smov 0   ;;  %s635_s14 = smov 0  }
   0x9   :  { %s637_s15 = smov 0   ;;  %s639_s16 = smov 0  }
   0xa   :  { %s641_s17 = smov 0   ;;  %s643_s18 = smov 0  }
   0xb   :  { %s645_s19 = smov 0  }
   0xc LB: > { %888 = sst [smem:[#allocation11_spill]] %s597_s17  ;;  %s304_s20 = sadd.s32 4294967295, %s605_s19   ;;  %s605_s19 = sphi %s645_s19, %s19_s19   ;;  %s601_s18 = sphi %s643_s18, %s916_s18   ;;  %s597_s17 = sphi %s641_s17, %s907_s17   ;;  %s593_s16 = sphi %s639_s16, %s915_s16   ;;  %s589_s15 = sphi %s637_s15, %s906_s15   ;;  %s585_s14 = sphi %s635_s14, %s914_s14   ;;  %s581_s13 = sphi %s633_s13, %s913_s13   ;;  %s577_s12 = sphi %s631_s12, %s912_s12   ;;  %s573_s11 = sphi %s629_s11, %s911_s11   ;;  %s569_s10 = sphi %s627_s10, %s910_s10   ;;  %s565_s9 = sphi %s625_s9, %s909_s9  }
   0xd   : > { %s305_s21 = sadd.s32 4294967294, %s605_s19   ;;  %p72_p0 = scmp.ne.s32.totalorder %s581_s13, %s577_s12 }
   0xe   : > { %p681_p1 = scmp.eq.s32.totalorder %s304_s20, 0  ;;  %s87_s23 = sadd.s32 1, %s573_s11 }
   0xf   : > { %p97_p2 = scmp.ne.s32.totalorder %s573_s11, %s569_s10  ;;  %p98_p4 = scmp.eq.s32.totalorder %s304_s20, 15 }
  0x10   : > { %s889_s22 = scalar_select %p681_p1, 1, 0 }
  0x11   : > { %p690_p3 = por %p681_p1, %p72_p0  ;;  %p103_p5 = scmp.ne.s32.totalorder %s569_s10, %s565_s9 }
  0x12   : > { %p104_p6 = scmp.eq.s32.totalorder %s305_s21, 15  ;;  %p696_p7 = por %p98_p4, %p97_p2 }
  0x13   : > { %s890_s24 = scalar_select %p690_p3, 1, 0 }
  0x14   : > { %s891_s25 = scalar_select %p696_p7, 1, 0 }
  0x15   : > { %p306_p8 = scmp.ge.s32.totalorder %s605_s19, 1  ;;  %p701_p9 = por %p104_p6, %p103_p5 }
  0x16   : > { %p111_p10 = scmp.lt.s32.totalorder %s605_s19, 17  ;;  %s28_s28 = sadd.s32 1, %s597_s17 }
  0x17   : > { %s892_s26 = scalar_select %p701_p9, 1, 0 }
  0x18   : > { %p706_p11 = pnand %p306_p8, %p111_p10  ;;  %s31_s29 = sadd.s32 1, %s601_s18 }
  0x19   : > { %893 = sst [smem:[#allocation12_spill]] %s892_s26  ;;  %p29_p0 = scmp.ge.s32.totalorder %s28_s28, 8 }
  0x1a   : > { %p331_p12 = pneg %p706_p11  ;;  %s895_s0 = sld [smem:[#allocation15_spill]] }
  0x1c   : > { %p332_p13 = pnand %p331_p12, %p681_p1 }
  0x1e   : > { %p438_p4 = pneg %p332_p13 }
  0x20   : > { %s436_s4 = scalar_lea.hbm %s895_s0, 16 }
  0x21   : > { %p437_p2 = scmp.ne.s32.totalorder %s895_s0, %s436_s4  ;;  %p443_p8 = scmp.lt.u32.totalorder %s436_s4, %s895_s0 }
  0x23   : > { %p439_p5 = pnand %p438_p4, %p437_p2 }
  0x25   : > { %p440_p6 = pneg %p439_p5 }
  0x27   : > { %p445_p10 = pnand %p443_p8, %p440_p6 }
  0x29   : > { %448 = shalt.err (!%p445_p10)
}
  0x2a   : > { %s607_s12 = smov [#allocation2]   ;;  %s918_s28 = smov (%p29_p0, %s28_s28), 0 }
  0x2b   : > { %334 = dma.hbm_to_smem (!%p332_p13), %s895_s0, 16, %s607_s12, [#allocation5]  }
  0x2c   : > { %896 = sst [smem:[#allocation13_spill]] %s918_s28  ;;  %s920_s29 = smov (!%p29_p0, %s31_s29), %s601_s18 }
  0x2d   : > { %s59_s30 = sadd.s32 1, %s585_s14  ;;  %p66_p12 = scmp.ne.s32.totalorder %s585_s14, %s581_s13 }
  0x2e   : > { %p33_p2 = scmp.ge.s32.totalorder %s920_s29, 2  ;;  %p67_p4 = scmp.eq.s32.totalorder %s605_s19, 0 }
  0x2f   : > { %s83_s3 = ssub.s32 %s597_s17, %s918_s28  ;;  %p344_p5 = scmp.lt.s32.totalorder %s605_s19, 16 }
  0x30   : > { %s922_s29 = smov (%p33_p2, %s920_s29), 0  ;;  %p740_p6 = por %p67_p4, %p66_p12 }
  0x31   : > { %897 = sst [smem:[#allocation14_spill]] %s922_s29  ;;  %s133_s5 = sand.u32 1, %s585_s14  }
  0x32   : > { %s56_s6 = ssub.s32 %s601_s18, %s922_s29  ;;  %s309_s8 = sshll.u32 %s133_s5, 3 }
  0x33   : > { %p57_p13 = scmp.eq.s32.totalorder %s56_s6, 0  ;;  %s84_s7 = sor.u32 %s83_s3, %s56_s6 }
  0x34   : > { %p85_p0 = scmp.eq.s32.totalorder %s84_s7, 0  ;;  %s322_s21 = sshll.u32 %s601_s18, 7 }
  0x35   : > { %s748_s12 = scalar_select %p57_p13, %s585_s14, %s59_s30  }
  0x36   : > { %s753_s20 = scalar_select %p85_p0, %s573_s11, %s87_s23  }
  0x37   : > { %s759_s17 = scalar_lea.hbm %s877_s1, %s322_s21  ;;  %s137_s29 = scalar_lea.vmem [#allocation6], %s309_s8 }
  0x38   : > { %s145_s26 = sshll.u32 %s137_s29, 4  ;;  %p767_p8 = pnand %p344_p5, %p740_p6  ;;  %s761_s26 = int_to_ptr.vmem [resolvable:$true] %s145_s26 }
  0x39   : > { %s134_s23 = scalar_lea.sflag [#allocation3], %s133_s5  ;;  %s449_s0 = scalar_lea.hbm %s759_s17, 128 }
  0x3a   : > { %p450_p10 = scmp.ne.s32.totalorder %s759_s17, %s449_s0  ;;  %p451_p12 = pneg %p767_p8 }
  0x3b   : > { %s454_s3 = scalar_lea.hbm %s877_s1, 256  ;;  %p455_p5 = scmp.lt.u32.totalorder %s759_s17, %s877_s1 }
  0x3c   : > { %p452_p2 = pnand %p451_p12, %p450_p10  ;;  %p456_p6 = scmp.lt.u32.totalorder %s454_s3, %s449_s0 }
  0x3d   : > { %p458_p0 = scmp.lt.u32.totalorder %s449_s0, %s759_s17 }
  0x3e   : > { %p453_p4 = pneg %p452_p2  ;;  %p457_p13 = por %p456_p6, %p455_p5 }
  0x40   : > { %p459_p9 = por %p458_p0, %p457_p13 }
  0x42   : > { %p460_p7 = pnand %p459_p9, %p453_p4 }
  0x44   : > { %463 = shalt.err (!%p460_p7)
}
  0x45   : > { %s464_s5 = scalar_lea.vmem %s761_s26, 128  ;;  %s608_s7 = smov [#allocation6]  }
  0x46   : > { %p465_p10 = scmp.ne.s32.totalorder %s761_s26, %s464_s5  ;;  %s469_s8 = sshll.u32 %s608_s7, 4  ;;  %s470_s8 = int_to_ptr.vmem [resolvable:$false] %s469_s8 }
  0x47   : > { %s471_s21 = scalar_lea.vmem %s470_s8, 256  ;;  %p472_p1 = scmp.lt.s32.totalorder %s761_s26, %s470_s8 }
  0x48   : > { %p467_p2 = pnand %p465_p10, %p451_p12  ;;  %p473_p5 = scmp.lt.s32.totalorder %s471_s21, %s464_s5 }
  0x4a   : > { %p468_p3 = pneg %p467_p2  ;;  %p474_p6 = por %p473_p5, %p472_p1 }
  0x4c   : > { %p475_p13 = pnand %p474_p6, %p468_p3 }
  0x4e   : > { %478 = shalt.err (!%p475_p13)
}
  0x4f   : > { %338 = dma.hbm_to_vmem [thread:$0]  (!%p767_p8), %s759_s17, 128, %s761_s26, %s134_s23  }
  0x50   : > { %154 = sbr.rel (%p706_p11) target bundleno = 123 (0x7b), region = 28  ;;  %p900_p7 = scmp.ne.s32.totalorder (!%p706_p11), %s889_s22, 0 }
  0x57   : > { %552 = dma.done.wait (%p900_p7), [#allocation5], 16  }
  0x58   : > { %554 = vsyncadd (%p900_p7), [#allocation5], 4294967280  ;;  %s160_s0 = sand.u32 1, %s581_s13   ;;  %p901_p1 = scmp.ne.s32.totalorder %s890_s24, 0 }
  0x59   : > { %s314_s28 = sshll.u32 %s160_s0, 3  ;;  %s161_s29 = scalar_lea.sflag [#allocation3], %s160_s0 }
  0x5a   : > { %s164_s3 = scalar_lea.vmem [#allocation6], %s314_s28 }
  0x5b   : > { %556 = dma.done.wait (%p901_p1), %s161_s29, 128  }
  0x5c   : > { %558 = vsyncadd (%p901_p1), %s161_s29, 4294967168 }
  0x5d   : > { %169 = sfence }
  0x5e   : > { %s183_s17 = sand.u32 1, %s569_s10   ;;  %s187_s26 = sld [smem:[#allocation2 + %s589_s15]]  ;;  %v186_v0 = vld [vmem:[%s164_s3] sm:$0xff] }
  0x5f   : > { %s315_s22 = sshll.u32 %s183_s17, 3  ;;  %s317_s27 = sshll.u32 %s589_s15, 1 }
  0x60   : > { %s318_s30 = sshll.u32 %s593_s16, 4  ;;  %s185_s23 = scalar_lea.vmem [#allocation7], %s315_s22 }
  0x61   : > { %s208_s4 = sshll.u32 %s185_s23, 4  ;;  %s204_s6 = sadd.s32 %s318_s30, %s317_s27  ;;  %s811_s4 = int_to_ptr.vmem [resolvable:$true] %s208_s4 }
  0x62   : > { %s319_s5 = sshll.u32 %s204_s6, 6  ;;  %s192_s15 = scalar_lea.sflag [#allocation4], %s183_s17 }
  0x63   : > { %s816_s8 = scalar_lea.hbm %s878_s2, %s319_s5  ;;  %s479_s16 = scalar_lea.vmem %s811_s4, 128 }
  0x64   : > { %v188_v1 = vstv %s187_s26  ;;  %p480_p3 = scmp.ne.s32.totalorder %s811_s4, %s479_s16  ;;  %p902_p9 = scmp.ne.s32.totalorder %s891_s25, 0 }
  0x65   : > { %v189_v2 = vmul.f32 %v188_v1, %v186_v0  ;;  %s609_s21 = smov [#allocation7]  }
  0x66   : > { %p481_p11 = pnand %p480_p3, %p902_p9  ;;  %s483_s0 = sshll.u32 %s609_s21, 4  ;;  %s484_s0 = int_to_ptr.vmem [resolvable:$false] %s483_s0 }
  0x67   : > { %190 = vst [vmem:[%s185_s23] sm:$0xff] %v189_v2  ;;  %s485_s28 = scalar_lea.vmem %s484_s0, 256  ;;  %p486_p12 = scmp.lt.s32.totalorder %s811_s4, %s484_s0 }
  0x68   : > { %p482_p8 = pneg %p481_p11  ;;  %p487_p4 = scmp.lt.s32.totalorder %s485_s28, %s479_s16 }
  0x6a   : > { %p488_p0 = por %p487_p4, %p486_p12 }
  0x6c   : > { %p489_p10 = pnand %p488_p0, %p482_p8 }
  0x6e   : > { %492 = shalt.err (!%p489_p10)
}
  0x6f   : > { %s493_s29 = scalar_lea.hbm %s816_s8, 128  ;;  %s497_s26 = scalar_lea.hbm %s878_s2, 2048 }
  0x70   : > { %p494_p2 = scmp.ne.s32.totalorder %s816_s8, %s493_s29  ;;  %p498_p13 = scmp.lt.u32.totalorder %s816_s8, %s878_s2 }
  0x71   : > { %p499_p7 = scmp.lt.u32.totalorder %s497_s26, %s493_s29  ;;  %p501_p3 = scmp.lt.u32.totalorder %s493_s29, %s816_s8 }
  0x72   : > { %p495_p5 = pnand %p494_p2, %p902_p9 }
  0x73   : > { %p500_p1 = por %p499_p7, %p498_p13 }
  0x74   : > { %p496_p6 = pneg %p495_p5 }
  0x75   : > { %p502_p11 = por %p501_p3, %p500_p1 }
  0x77   : > { %p503_p8 = pnand %p502_p11, %p496_p6 }
  0x79   : > { %506 = shalt.err (!%p503_p8)
}
  0x7a   : > { %329 = dma.vmem_to_hbm [thread:$0]  (%p902_p9), %s811_s4, 128, %s816_s8, %s192_s15  }
  0x7b PF: > { %s903_s30 = sld [smem:[#allocation12_spill]]  ;;  %p346_p12 = scmp.ge.s32.totalorder %s605_s19, 2 }
  0x7c   : > { %s220_s23 = sand.u32 1, %s565_s9  }
  0x7d   : > { %s221_s6 = scalar_lea.sflag [#allocation4], %s220_s23 }
  0x81   : > { %p904_p4 = scmp.ne.s32.totalorder %s903_s30, 0 }
  0x83   : > { %p340_p0 = pnand %p346_p12, %p904_p4 }
  0x85   : > { %560 = dma.done.wait (!%p340_p0), %s221_s6, 128  }
  0x86   : > { %562 = vsyncadd (!%p340_p0), %s221_s6, 4294967168  ;;  %s19_s19 = sadd.s32 1, %s605_s19   ;;  %s905_s25 = smov %s748_s12 }
  0x87   : > { %p16_p10 = scmp.ge.s32.totalorder %s19_s19, 18   ;;  %s906_s15 = sld [smem:[#allocation11_spill]] }
  0x88   : > { %s907_s17 = sld [smem:[#allocation13_spill]]  ;;  %s908_s4 = sld [smem:[#allocation14_spill]] }
  0x89   : > { %s909_s9 = smov %s569_s10  ;;  %s910_s10 = smov %s573_s11 }
  0x8a   : > { %s911_s11 = smov %s753_s20  ;;  %s912_s12 = smov %s581_s13 }
  0x8b   : > { %s913_s13 = smov %s585_s14  ;;  %s914_s14 = smov %s905_s25 }
  0x8c   : > { %s915_s16 = smov %s601_s18  ;;  %18 = sbr.rel (!%p16_p10) target bundleno = 12 (0xc), region = 78 }
  0x8e   : > { %s916_s18 = smov %s908_s4 }
  0x93   :  { %226 = vsyncpa [#allocation3], 1 }
  0x94   :  { %228 = vsyncpa [#allocation3 + $0x1], 1 }
  0x95   :  { %229 = vsyncpa [#allocation4], 1 }
  0x96   :  { %231 = vsyncpa [#allocation4 + $0x1], 1 }
  0x97   :  { %232 = vsyncpa [#allocation5], 1 }
  0x98   :  { %234 = vsyncpa [#allocation5 + $0x1], 1 }

</bundles_post_ra>
